<compile_context>
chip_gen: v7x
topology: tpu7x:2x2x1
jax: 0.10.0
libtpu: 0.0.40
codegen_flags: <defaults>
</compile_context>

<pallas_src>
import functools

import jax
import jax.numpy as jnp
from jax.experimental import pallas as pl
from jax.experimental.pallas import tpu as pltpu

LANES = 128
SUBLANES = 8
# (2048, 128) f32 block = 1 MiB; double-buffered in+out for the quant pass is
# ~4 MiB VMEM -> safely inside the 32 MiB scoped limit on v5e/v6e/v7x.
MAX_BLOCK_ROWS = 2048


def _absmax_kernel(x_ref, o_ref):
    x = jnp.abs(x_ref[...].astype(jnp.float32))
    bk = x.shape[0] // SUBLANES
    # (block_rows, 128) -> (bk, 8, 128) is a free re-tiling view; the axis-0
    # max is pure VPU work.  The final (8,128) -> scalar reduce happens once,
    # outside the kernel, on a tiny array.
    part = jnp.max(x.reshape(bk, SUBLANES, LANES), axis=0)
    o_ref[...] = part[None]


def _quant_kernel(scale_ref, x_ref, o_ref, *, min_val, max_val, fake_quant,
                  scale_is_tmax):
    s = scale_ref[0]
    if scale_is_tmax:
        # compute_scaling_factor: t_max == 0 -> 1.0 ; sf = max_val / t_max
        t_max = jnp.where(s == 0.0, jnp.float32(1.0), s)
        sf = jnp.float32(max_val) / t_max
    else:
        sf = s
    x = x_ref[...].astype(jnp.float32)
    q = jnp.clip(jnp.round(sf * x), min_val, max_val)
    if fake_quant:
        inv_sf = 1.0 / sf  # one reciprocal per block; elementwise op stays a VPU mul
        o_ref[...] = (q * inv_sf).astype(o_ref.dtype)
    else:
        o_ref[...] = q.astype(o_ref.dtype)


def _to_slab(x):
    """Flatten to a (rows, 128) slab in the original dtype; rows % block == 0."""
    flat = x.reshape(-1)
    n = flat.shape[0]
    rows_min = -(-n // LANES)
    rows_min = -(-rows_min // SUBLANES) * SUBLANES
    block_rows = min(MAX_BLOCK_ROWS, rows_min)
    rows = -(-rows_min // block_rows) * block_rows
    pad = rows * LANES - n
    if pad:
        # TODO(synk): for non lane-aligned sizes this jnp.pad (and the final
        # un-pad slice) is a full-tensor HBM copy; an in-kernel ragged-tail
        # mask would avoid it but needs n % 128 == 0 to reshape for free.
        flat = jnp.pad(flat, (0, pad))
    return flat.reshape(rows, LANES), n, block_rows


def pallas_absmax(x2d, block_rows):
    rows = x2d.shape[0]
    num_blocks = rows // block_rows
    return pl.pallas_call(
        _absmax_kernel,
        out_shape=jax.ShapeDtypeStruct((num_blocks, SUBLANES, LANES),
                                       jnp.float32),
        grid_spec=pltpu.PrefetchScalarGridSpec(
            num_scalar_prefetch=0,
            grid=(num_blocks,),
            in_specs=[pl.BlockSpec((block_rows, LANES), lambda i: (i, 0))],
            out_specs=pl.BlockSpec((1, SUBLANES, LANES), lambda i: (i, 0, 0)),
        ),
        compiler_params=pltpu.CompilerParams(
            dimension_semantics=("parallel",)),
    )(x2d)


def pallas_quant(x2d, scale, min_val, max_val, block_rows, *, out_dtype,
                 fake_quant, scale_is_tmax):
    rows = x2d.shape[0]
    num_blocks = rows // block_rows
    kern = functools.partial(
        _quant_kernel, min_val=float(min_val), max_val=float(max_val),
        fake_quant=fake_quant, scale_is_tmax=scale_is_tmax)
    return pl.pallas_call(
        kern,
        out_shape=jax.ShapeDtypeStruct((rows, LANES), out_dtype),
        grid_spec=pltpu.PrefetchScalarGridSpec(
            num_scalar_prefetch=1,
            grid=(num_blocks,),
            in_specs=[pl.BlockSpec((block_rows, LANES), lambda i, s: (i, 0))],
            out_specs=pl.BlockSpec((block_rows, LANES), lambda i, s: (i, 0)),
        ),
        compiler_params=pltpu.CompilerParams(
            dimension_semantics=("parallel",)),
    )(scale, x2d)


def act_quantizer_forward(x, min_val, max_val, scaling_factor=None,
                          fake_quant=True, dtype=jnp.int32):
    """JAX/Pallas equivalent of act_quantizer.forward."""
    orig_shape = x.shape
    orig_dtype = x.dtype
    x2d, n, block_rows = _to_slab(x)

    if scaling_factor is None:
        partials = pallas_absmax(x2d, block_rows)
        # Tiny final reduce over (num_blocks, 8, 128); the t_max==0 handling and
        # sf = max_val / t_max are fused into the quant kernel.
        scale = jnp.max(partials).reshape(1).astype(jnp.float32)
        scale_is_tmax = True
    else:
        scale = jnp.asarray([scaling_factor], dtype=jnp.float32)
        scale_is_tmax = False

    out_dtype = orig_dtype if fake_quant else dtype
    q2d = pallas_quant(x2d, scale, min_val, max_val, block_rows,
                       out_dtype=out_dtype, fake_quant=fake_quant,
                       scale_is_tmax=scale_is_tmax)

    if q2d.size == n:
        return q2d.reshape(orig_shape)
    return q2d.reshape(-1)[:n].reshape(orig_shape)


# ------------------------- pure-JAX references -------------------------------

def _ref_scale(xf, max_val, scaling_factor):
    if scaling_factor is None:
        t_max = jnp.maximum(jnp.abs(jnp.min(xf)), jnp.abs(jnp.max(xf)))
        t_max = jnp.where(t_max == 0.0, 1.0, t_max)
        return jnp.float32(max_val) / t_max
    return jnp.float32(scaling_factor)


def _reference_fake(x, min_val, max_val, scaling_factor=None):
    xf = x.astype(jnp.float32)
    sf = _ref_scale(xf, max_val, scaling_factor)
    return (jnp.clip(jnp.round(sf * xf), min_val, max_val) / sf).astype(x.dtype)


def _reference_int(x, min_val, max_val, scaling_factor=None, dtype=jnp.int32):
    xf = x.astype(jnp.float32)
    sf = _ref_scale(xf, max_val, scaling_factor)
    return jnp.clip(jnp.round(sf * xf), min_val, max_val).astype(dtype)


if __name__ == "__main__":
    key = jax.random.PRNGKey(0)
    min_val, max_val = -128.0, 127.0  # int8-like range

    # 1) primary: NCHW activation, module defaults (fake_quant, dynamic scale)
    x = jax.random.normal(key, (2, 4, 16, 16), dtype=jnp.float32)
    out = jax.block_until_ready(act_quantizer_forward(x, min_val, max_val))
    ref = _reference_fake(x, min_val, max_val)
    assert out.shape == x.shape and out.dtype == x.dtype
    assert jnp.allclose(out, ref, atol=1e-5, rtol=1e-5)

    # 2) non lane-aligned shape + provided scaling factor (pad / un-pad path)
    y = jax.random.normal(jax.random.PRNGKey(1), (2, 3, 7, 5), dtype=jnp.float32)
    out2 = jax.block_until_ready(
        act_quantizer_forward(y, min_val, max_val, scaling_factor=12.5))
    ref2 = _reference_fake(y, min_val, max_val, scaling_factor=12.5)
    assert out2.shape == y.shape
    assert jnp.allclose(out2, ref2, atol=1e-5, rtol=1e-5)

    # 3) multi-block grid + int_quantize_tensor path (fake_quant=False)
    z = jax.random.normal(jax.random.PRNGKey(2), (8, 64, 32, 32),
                          dtype=jnp.float32)
    out3 = jax.block_until_ready(
        act_quantizer_forward(z, min_val, max_val, fake_quant=False))
    ref3 = _reference_int(z, min_val, max_val)
    assert out3.dtype == jnp.int32
    assert jnp.array_equal(out3, ref3)

    print("KERNEL_OK")
</pallas_src>

<mosaic_0001>
module attributes {stable_mosaic.version = 11 : i64} {
  func.func @_absmax_kernel(%arg0: i32, %arg1: memref<16x128xf32, #tpu.memory_space<vmem>>, %arg2: memref<1x8x128xf32, #tpu.memory_space<vmem>>) attributes {dimension_semantics = [#tpu.dimension_semantics<parallel>], iteration_bounds = array<i64: 1>, scalar_prefetch = 0 : i64, scratch_operands = 0 : i64, tpu.core_type = #tpu.core_type<tc>, window_params = [{transform_indices = @transform_0, window_bounds = array<i64: 16, 128>}, {transform_indices = @transform_1, window_bounds = array<i64: 1, 8, 128>}]} {
    %c0 = arith.constant 0 : index
    %c0_0 = arith.constant 0 : index
    %0 = vector.load %arg1[%c0, %c0_0] : memref<16x128xf32, #tpu.memory_space<vmem>>, vector<16x128xf32>
    %1 = math.absf %0 : vector<16x128xf32>
    %2 = vector.shape_cast %1 : vector<16x128xf32> to vector<2x8x128xf32>
    %cst = arith.constant dense<0xFF800000> : vector<8x128xf32>
    %3 = vector.multi_reduction <maximumf>, %2, %cst [0] : vector<2x8x128xf32> to vector<8x128xf32>
    %4 = vector.shape_cast %3 : vector<8x128xf32> to vector<1x8x128xf32>
    %c0_1 = arith.constant 0 : index
    %c0_2 = arith.constant 0 : index
    %c0_3 = arith.constant 0 : index
    %5 = vector.load %arg2[%c0_1, %c0_2, %c0_3] : memref<1x8x128xf32, #tpu.memory_space<vmem>>, vector<1x8x128xf32>
    tpu.vector_store %arg2[%c0_1, %c0_2, %c0_3], %4 {strides = array<i32>} : memref<1x8x128xf32, #tpu.memory_space<vmem>>, vector<1x8x128xf32>,
    return
  }
  func.func @transform_0(%arg0: i32) -> (i32, i32) {
    %c0_i32 = arith.constant 0 : i32
    %c0_i32_0 = arith.constant 0 : i32
    return %arg0, %c0_i32 : i32, i32
  }
  func.func @transform_1(%arg0: i32) -> (i32, i32, i32) {
    %c0_i32 = arith.constant 0 : i32
    %c0_i32_0 = arith.constant 0 : i32
    %c0_i32_1 = arith.constant 0 : i32
    return %arg0, %c0_i32, %c0_i32_0 : i32, i32, i32
  }
}

</mosaic_0001>

<bundles_post_ra>
// kernel: tpu_custom_call.1
= control target key start
LH: loop header
LB: loop body
LE: loop exit
PB: predicated region body
PF: predicated region fallthrough
CT: control target
= control target key end

     0   :  { %6 = vsyncpa [#allocation3], 0  ;;  %s134_s0 = inlined_call_operand.hbm [shape: f32[16,128], index: 0, kind: input, shape index: {}]   ;;  %s135_s1 = inlined_call_operand.hbm [shape: f32[1,8,128], index: 1, kind: output, shape index: {}]  }
   0x1   :  { %7 = vsyncpa [#allocation4], 0  ;;  %s96_s6 = smov [#allocation2]   ;;  %s48_s10 = scalar_lea.hbm %s134_s0, 256 }
   0x2   :  { %s13_s7 = sshll.u32 %s96_s6, 4  ;;  %p49_p0 = scmp.ne.s32.totalorder %s134_s0, %s48_s10  ;;  %s14_s7 = int_to_ptr.vmem [resolvable:$true] %s13_s7 }
   0x3   :  { %p52_p1 = scmp.lt.u32.totalorder %s48_s10, %s134_s0 }
   0x5   :  { %p54_p2 = pnand %p52_p1, %p49_p0 }
   0x7   :  { %57 = shalt.err (!%p54_p2)
}
   0x8   :  { %s58_s15 = scalar_lea.vmem %s14_s7, 256  ;;  %p63_p4 = scmp.lt.s32.totalorder %s14_s7, %s14_s7 }
   0x9   :  { %p59_p3 = scmp.ne.s32.totalorder %s14_s7, %s58_s15  ;;  %p64_p5 = scmp.lt.s32.totalorder %s58_s15, %s58_s15 }
   0xb   :  { %p65_p6 = por %p64_p5, %p63_p4 }
   0xd   :  { %p66_p7 = pnand %p65_p6, %p59_p3 }
   0xf   :  { %69 = shalt.err (!%p66_p7)
}
  0x10   :  { %s97_s16 = smov 128   ;;  %s98_s17 = smov 8  }
  0x11   :  { %19 = dma.hbm_to_vmem [thread:$0]  %s134_s0, 256, %s14_s7, [#allocation3], %s97_s16, %s97_s16, %s98_s17  }
  0x12   :  { %92 = dma.done.wait [#allocation3], 256  }
  0x13   :  { %93 = vsyncadd [#allocation3], 4294967040  ;;  %v23_v0 = vld [vmem:[#allocation2] sm:$0xff]  ;;  %v24_v1 = vld [vmem:[#allocation2 + $0x8] sm:$0xff]  ;;  %s99_s20 = smov [#allocation5]  }
  0x14   :  { %s35_s21 = sshll.u32 %s99_s20, 4  ;;  %v25_v2 = vand.u32 2147483647, %v23_v0  ;;  %v26_v3 = vand.u32 2147483647, %v24_v1  ;;  %s36_s21 = int_to_ptr.vmem [resolvable:$true] %s35_s21 }
  0x15   :  { %s70_s22 = scalar_lea.vmem %s36_s21, 128  ;;  %p75_p9 = scmp.lt.s32.totalorder %s36_s21, %s36_s21 }
  0x16   :  { %v27_v4 = vmax.f32.f32 %v25_v2, %v26_v3  ;;  %p71_p8 = scmp.ne.s32.totalorder %s36_s21, %s70_s22  ;;  %p76_p10 = scmp.lt.s32.totalorder %s70_s22, %s70_s22 }
  0x18   :  { %28 = vst [vmem:[#allocation5] sm:$0xff] %v27_v4  ;;  %p77_p11 = por %p76_p10, %p75_p9 }
  0x1a   :  { %p78_p12 = pnand %p77_p11, %p71_p8 }
  0x1c   :  { %81 = shalt.err (!%p78_p12)
}
  0x1d   :  { %s82_s24 = scalar_lea.hbm %s135_s1, 128 }
  0x1e   :  { %p83_p13 = scmp.ne.s32.totalorder %s135_s1, %s82_s24  ;;  %p86_p0 = scmp.lt.u32.totalorder %s82_s24, %s135_s1 }
  0x20   :  { %p88_p1 = pnand %p86_p0, %p83_p13 }
  0x22   :  { %91 = shalt.err (!%p88_p1)
}
  0x23   :  { %38 = dma.vmem_to_hbm [thread:$0]  %s36_s21, 128, %s135_s1, [#allocation4]  }
  0x24   :  { %94 = dma.done.wait [#allocation4], 128  }
  0x25   :  { %95 = vsyncadd [#allocation4], 4294967168 }
  0x26   :  { %42 = vsyncpa [#allocation3], 1 }
  0x27   :  { %43 = vsyncpa [#allocation4], 1 }

</bundles_post_ra>
